<compile_context>
chip_gen: v5e
topology: v5e:2x2
jax: 0.10.0
libtpu: 0.0.40
codegen_flags: <defaults>
</compile_context>

<pallas_src>
import functools

import jax
import jax.numpy as jnp
from jax.experimental import pallas as pl
from jax.experimental.pallas import tpu as pltpu


# ----------------------------------------------------------------------------
# Per-generation VMEM budgeting (v5e/v6e: 128 MiB physical, v7x: 64 MiB).
# ----------------------------------------------------------------------------
@functools.lru_cache(maxsize=None)
def _vmem_capacity_bytes():
    try:
        return int(pltpu.get_tpu_info().vmem_capacity_bytes)
    except Exception:
        return 64 << 20          # conservative (v7x per-core) fallback


def _scoped_vmem_limit():
    # Raise the scoped-VMEM limit above the 16/32 MiB defaults, with headroom
    # for compiler scratch.
    return int(min(_vmem_capacity_bytes() * 3 // 4, 96 << 20))


def _vmem_block_budget():
    # Bytes allowed for the explicitly-accounted per-step working set
    # (resident matrices + double-buffered blocks + in-kernel intermediates).
    return int(max(12 << 20, _vmem_capacity_bytes() // 3))


# ----------------------------------------------------------------------------
# Pointwise (1x1x1) conv on concat(CT, PET): pure VPU FMAs, lane-dense slabs.
# ----------------------------------------------------------------------------
def _pointwise_kernel(w_ref, b_ref, ct_ref, pet_ref, o_ref):
    # w_ref: SMEM (2*Cin, Cout), b_ref: SMEM (Cout,)
    # ct_ref / pet_ref: VMEM (1, Cin, TR, LW); o_ref: VMEM (1, Cout, TR, LW)
    cin = ct_ref.shape[1]
    cout = o_ref.shape[1]
    for c in range(cout):                       # static unroll (tiny)
        acc = jnp.full(o_ref.shape[2:], b_ref[c], dtype=jnp.float32)
        for k in range(cin):
            acc = acc + w_ref[k, c] * ct_ref[0, k]
            acc = acc + w_ref[cin + k, c] * pet_ref[0, k]
        o_ref[0, c] = acc


def _pointwise_pallas(ct_s, pet_s, w, bias):
    n, cin, d, h, wd = ct_s.shape
    cout = w.shape[1]
    vol = d * h * wd

    # Lane-dense layout: flatten (D,H,W) onto (rows, LW), LW in 512..2048.
    lw = 512
    while vol % (lw * 2) == 0 and lw < 2048:
        lw *= 2
    rows = vol // lw

    row_bytes = (2 * cin + cout) * lw * 4            # f32
    budget = _vmem_block_budget()
    if rows * row_bytes * 2 <= budget:
        tr = rows
    else:
        tr = max(8, (budget // (row_bytes * 2)) // 8 * 8)
        tr = min(tr, rows)

    ct4 = ct_s.reshape(n, cin, rows, lw).astype(jnp.float32)
    pet4 = pet_s.reshape(n, cin, rows, lw).astype(jnp.float32)
    w2 = w.astype(jnp.float32)
    b1 = bias.astype(jnp.float32)

    out = pl.pallas_call(
        _pointwise_kernel,
        out_shape=jax.ShapeDtypeStruct((n, cout, rows, lw), jnp.float32),
        grid=(n, pl.cdiv(rows, tr)),
        in_specs=[
            pl.BlockSpec(memory_space=pltpu.MemorySpace.SMEM),   # weights
            pl.BlockSpec(memory_space=pltpu.MemorySpace.SMEM),   # bias
            pl.BlockSpec((1, cin, tr, lw), lambda i, j: (i, 0, j, 0)),
            pl.BlockSpec((1, cin, tr, lw), lambda i, j: (i, 0, j, 0)),
        ],
        out_specs=pl.BlockSpec((1, cout, tr, lw), lambda i, j: (i, 0, j, 0)),
        compiler_params=pltpu.CompilerParams(
            dimension_semantics=("parallel", "parallel"),
            vmem_limit_bytes=_scoped_vmem_limit()),
    )(w2, b1, ct4, pet4)
    return out.reshape(n, cout, d, h, wd)


def _pointwise_xla(ct_s, pet_s, w, bias):
    x = jnp.concatenate([ct_s, pet_s], axis=1).astype(jnp.float32)
    y = jnp.einsum('kc,nkdhw->ncdhw', w.astype(jnp.float32), x,
                   precision=jax.lax.Precision.HIGHEST)
    return y + bias.astype(jnp.float32)[None, :, None, None, None]


def pointwise_conv(ct_s, pet_s, w, bias):
    """y[:, c] = sum_k w[k, c] * concat(ct, pet)[:, k] + bias[c]."""
    _, _, d, h, wd = ct_s.shape
    if (d * h * wd) % 512 == 0:
        return _pointwise_pallas(ct_s, pet_s, w, bias)
    # Tiny coarse levels (stride >= 4): launch/per-step overhead dominates a
    # Pallas call and blocks would be lane-sparse; plain XLA is faster here.
    return _pointwise_xla(ct_s, pet_s, w, bias)


# ----------------------------------------------------------------------------
# Trilinear interpolation (align_corners=True), exact PyTorch semantics.
# ----------------------------------------------------------------------------
def _interp_matrix(size_in, size_out):
    """M such that y = M @ x is 1-D linear interpolation, align_corners=True."""
    if size_out > 1:
        scale = (size_in - 1) / (size_out - 1)
    else:
        scale = 0.0              # PyTorch: output of size 1 samples input[0]
    pos = jnp.arange(size_out, dtype=jnp.float32) * jnp.float32(scale)
    i0 = jnp.clip(jnp.floor(pos).astype(jnp.int32), 0, size_in - 1)
    i1 = jnp.minimum(i0 + 1, size_in - 1)
    frac = pos - i0.astype(jnp.float32)
    oh0 = jax.nn.one_hot(i0, size_in, dtype=jnp.float32)
    oh1 = jax.nn.one_hot(i1, size_in, dtype=jnp.float32)
    return (1.0 - frac)[:, None] * oh0 + frac[:, None] * oh1   # (out, in)


# --- fused single-kernel Kronecker path (batched into MXU M dimension) -------
def _interp_kron_kernel(x_ref, mhwT_ref, mdk_ref, o_ref):
    # x: (Bt*Di, HiWi) bf16; mhwT: (HiWi, HoWo) bf16; mdk: (Bt*Do, Bt*Di) bf16
    # o: (Bt*Do, HoWo) f32.  Two flat MXU matmuls, f32 accumulation.
    t = jnp.dot(x_ref[...], mhwT_ref[...], preferred_element_type=jnp.float32)
    o_ref[...] = jnp.dot(mdk_ref[...], t.astype(jnp.bfloat16),
                         preferred_element_type=jnp.float32)


def _kron_step_bytes(di, do, hiwi, howo, bt):
    mhwT = hiwi * howo * 2                 # bf16, resident
    mdk = (bt * do) * (bt * di) * 2        # bf16, resident
    x_blk = 2 * bt * di * hiwi * 2         # double-buffered bf16 input block
    o_blk = 2 * bt * do * howo * 4         # double-buffered f32 output block
    t_mid = bt * di * howo * 4             # in-kernel f32 intermediate
    return mhwT + mdk + x_blk + o_blk + t_mid


def _pick_kron_bt(b, di, do, hiwi, howo, budget):
    """Batch tile for the kron path, or None if it does not fit VMEM."""
    cands = []
    for bt in range(1, b + 1):
        if b % bt:
            continue
        # (8,128) constraints on the sublane-side block dims.
        if (bt * di) % 8 != 0 and bt != b:
            continue
        if (bt * do) % 8 != 0 and bt != b:
            continue
        if _kron_step_bytes(di, do, hiwi, howo, bt) > budget:
            continue
        cands.append(bt)
    if not cands:
        return None
    # Prefer >=2 grid steps (v7x megacore) while keeping MXU M = bt*di <= 512.
    multi = [bt for bt in cands if b // bt >= 2 and bt * di <= 512]
    if multi:
        return max(multi)
    small = [bt for bt in cands if bt * di <= 512]
    return max(small) if small else min(cands)


def _trilinear_kron(x, out_dhw, bt):
    n, c, di, hi, wi = x.shape
    do, ho, wo = out_dhw
    b = n * c
    hiwi, howo = hi * wi, ho * wo

    mhwT = jnp.kron(_interp_matrix(hi, ho),
                    _interp_matrix(wi, wo)).T.astype(jnp.bfloat16)  # (HiWi,HoWo)
    md = _interp_matrix(di, do)                                     # (Do, Di)
    # Block-diagonal D-interp acting on bt stacked items -> flat 2-D matmul.
    mdk = jnp.kron(jnp.eye(bt, dtype=jnp.float32), md).astype(jnp.bfloat16)

    x2 = x.reshape(b * di, hiwi).astype(jnp.bfloat16)

    out = pl.pallas_call(
        _interp_kron_kernel,
        out_shape=jax.ShapeDtypeStruct((b * do, howo), jnp.float32),
        grid=(b // bt,),
        in_specs=[
            pl.BlockSpec((bt * di, hiwi), lambda i: (i, 0)),
            pl.BlockSpec((hiwi, howo), lambda i: (0, 0)),
            pl.BlockSpec((bt * do, bt * di), lambda i: (0, 0)),
        ],
        out_specs=pl.BlockSpec((bt * do, howo), lambda i: (i, 0)),
        compiler_params=pltpu.CompilerParams(
            dimension_semantics=("parallel",),
            vmem_limit_bytes=_scoped_vmem_limit()),
    )(x2, mhwT, mdk)
    return out.reshape(n, c, do, ho, wo)


# --- two-stage fallback for volumes whose HW Kronecker matrix is too big -----
def _interp_hw_kernel(x_ref, mh_ref, mwT_ref, o_ref):
    # x: (1, TD, Hi, Wi) bf16; mh: (Ho, Hi) bf16; mwT: (Wi, Wo) bf16
    # o: (1, TD, Ho, Wo) f32
    td = x_ref.shape[1]
    for d in range(td):                         # static unroll, TD <= 8
        t = jnp.dot(mh_ref[...], x_ref[0, d], preferred_element_type=jnp.float32)
        o_ref[0, d] = jnp.dot(t.astype(jnp.bfloat16), mwT_ref[...],
                              preferred_element_type=jnp.float32)


def _interp_d_kernel(y_ref, md_ref, o_ref):
    # y: (1, Di, TL) f32; md: (Do, Di) f32; o: (1, Do, TL) f32
    o_ref[0] = jnp.dot(md_ref[...], y_ref[0], preferred_element_type=jnp.float32)


def _trilinear_two_stage(x, out_dhw):
    # TODO(synk): fuse the D interp into stage 1 (stream Di slabs with
    # pltpu.emit_pipeline + a (Do, TL) accumulator) to remove the intermediate
    # HBM round trip; not needed at the sizes exercised here.
    n, c, di, hi, wi = x.shape
    do, ho, wo = out_dhw
    b = n * c
    mh = _interp_matrix(hi, ho).astype(jnp.bfloat16)      # (Ho, Hi)
    mwT = _interp_matrix(wi, wo).T.astype(jnp.bfloat16)   # (Wi, Wo)
    md = _interp_matrix(di, do)                           # (Do, Di) f32
    x4 = x.reshape(b, di, hi, wi).astype(jnp.bfloat16)

    td = 8
    while di % td:
        td //= 2

    # stage 1: H and W interp, TD depth slices per grid step
    y = pl.pallas_call(
        _interp_hw_kernel,
        out_shape=jax.ShapeDtypeStruct((b, di, ho, wo), jnp.float32),
        grid=(b, di // td),
        in_specs=[
            pl.BlockSpec((1, td, hi, wi), lambda i, j: (i, j, 0, 0)),
            pl.BlockSpec((ho, hi), lambda i, j: (0, 0)),
            pl.BlockSpec((wi, wo), lambda i, j: (0, 0)),
        ],
        out_specs=pl.BlockSpec((1, td, ho, wo), lambda i, j: (i, j, 0, 0)),
        compiler_params=pltpu.CompilerParams(
            dimension_semantics=("parallel", "parallel"),
            vmem_limit_bytes=_scoped_vmem_limit()),
    )(x4, mh, mwT)

    # stage 2: D interp, lane-tiled over Ho*Wo
    howo = ho * wo
    y3 = y.reshape(b, di, howo)
    per_lane = (di + do) * 4 * 2              # double-buffered in+out, f32
    budget = _vmem_block_budget()
    if howo * per_lane <= budget:
        tl = howo
    else:
        tl = max(128, (budget // per_lane) // 128 * 128)

    out = pl.pallas_call(
        _interp_d_kernel,
        out_shape=jax.ShapeDtypeStruct((b, do, howo), jnp.float32),
        grid=(b, pl.cdiv(howo, tl)),
        in_specs=[
            pl.BlockSpec((1, di, tl), lambda i, j: (i, 0, j)),
            pl.BlockSpec((do, di), lambda i, j: (0, 0)),
        ],
        out_specs=pl.BlockSpec((1, do, tl), lambda i, j: (i, 0, j)),
        compiler_params=pltpu.CompilerParams(
            dimension_semantics=("parallel", "parallel"),
            vmem_limit_bytes=_scoped_vmem_limit()),
    )(y3, md)
    return out.reshape(n, c, do, ho, wo)


def trilinear_interpolate(x, out_dhw, force_two_stage=False):
    """x: (N, C, Di, Hi, Wi) -> (N, C, Do, Ho, Wo); trilinear, align_corners=True."""
    n, c, di, hi, wi = x.shape
    do, ho, wo = out_dhw
    if (di, hi, wi) == (do, ho, wo):
        # align_corners=True interpolation at the source size is the identity.
        return x.astype(jnp.float32)
    bt = None
    if not force_two_stage:
        bt = _pick_kron_bt(n * c, di, do, hi * wi, ho * wo, _vmem_block_budget())
    if bt is not None:
        return _trilinear_kron(x, out_dhw, bt)
    return _trilinear_two_stage(x, out_dhw)


def _trilinear_reference(x, out_dhw):
    """Pure-JAX reference for validation."""
    _, _, di, hi, wi = x.shape
    do, ho, wo = out_dhw
    md = _interp_matrix(di, do)
    mh = _interp_matrix(hi, ho)
    mw = _interp_matrix(wi, wo)
    return jnp.einsum('pd,qh,rw,nkdhw->nkpqr', md, mh, mw, x,
                      precision=jax.lax.Precision.HIGHEST)


# ----------------------------------------------------------------------------
# Synthetic encoder/decoder stand-in producing 5 multi-scale predictions.
# ----------------------------------------------------------------------------
def _avg_pool3d(x, s):
    if s == 1:
        return x
    n, c, d, h, w = x.shape
    x = x.reshape(n, c, d // s, s, h // s, s, w // s, s)
    return x.mean(axis=(3, 5, 7))


def make_params(in_channels, n_classes, num_scales=5, seed=42):
    key = jax.random.PRNGKey(seed)
    params = []
    cin = 2 * in_channels   # concat(CT, PET)
    for _ in range(num_scales):
        key, kw, kb = jax.random.split(key, 3)
        w = jax.random.normal(kw, (cin, n_classes), dtype=jnp.float32) * 0.1
        b = jax.random.normal(kb, (n_classes,), dtype=jnp.float32) * 0.01
        params.append((w, b))
    return params


def synthetic_encoder_decoder(ct, pet, params):
    """5 prediction maps at strides [1, 2, 4, 8, 16] with n_classes channels."""
    preds = []
    for level, (w, b) in enumerate(params):
        s = 2 ** level
        preds.append(pointwise_conv(_avg_pool3d(ct, s), _avg_pool3d(pet, s), w, b))
    return preds


# ----------------------------------------------------------------------------
# H2ASeg forward
# ----------------------------------------------------------------------------
def h2aseg_forward(ct, pet, params):
    preds = synthetic_encoder_decoder(ct, pet, params)
    out_dhw = tuple(ct.shape[-3:])
    # pred_i = F.interpolate(pred_i, size=ct.size()[-3:], mode='trilinear',
    #                        align_corners=True)
    return tuple(trilinear_interpolate(p, out_dhw) for p in preds)


if __name__ == "__main__":
    patch_size = (16, 16, 16)
    in_channels = 1
    n_classes = 2

    key = jax.random.PRNGKey(0)
    k_ct, k_pet = jax.random.split(key)
    ct = jax.random.normal(k_ct, (2, in_channels, *patch_size), dtype=jnp.float32)
    pet = jax.random.normal(k_pet, (2, in_channels, *patch_size), dtype=jnp.float32)
    params = make_params(in_channels, n_classes)

    fwd = jax.jit(h2aseg_forward)
    outs = jax.block_until_ready(fwd(ct, pet, params))

    # sanity: all five predictions upsampled to the CT spatial size, finite
    for o in outs:
        assert o.shape == (2, n_classes, *patch_size), o.shape
        assert bool(jnp.all(jnp.isfinite(o)))

    # --- self-checks against pure-JAX references -----------------------------
    # 1) lane-dense VPU pointwise conv vs einsum (level-0 shapes, L = 4096)
    w0, b0 = params[0]
    x_cat = jnp.concatenate([ct, pet], axis=1)
    ref_pw = jnp.einsum('kc,nkdhw->ncdhw', w0, x_cat,
                        precision=jax.lax.Precision.HIGHEST)
    ref_pw = ref_pw + b0[None, :, None, None, None]
    got_pw = pointwise_conv(ct, pet, w0, b0)
    assert bool(jnp.allclose(got_pw, ref_pw, atol=1e-3, rtol=1e-3))

    # 2) identity skip (level 0) is exact
    p_id = jax.random.normal(jax.random.PRNGKey(2), (2, n_classes, *patch_size),
                             dtype=jnp.float32)
    assert bool(jnp.array_equal(trilinear_interpolate(p_id, patch_size), p_id))

    # 3) fused kron interp (bf16 MXU operands, f32 acc) vs f32 reference
    for i, src in enumerate([(8, 8, 8), (4, 4, 4), (2, 2, 2), (1, 1, 1)]):
        p = jax.random.normal(jax.random.PRNGKey(3 + i), (2, n_classes, *src),
                              dtype=jnp.float32)
        ref = _trilinear_reference(p, patch_size)
        got = trilinear_interpolate(p, patch_size)
        assert bool(jnp.allclose(got, ref, atol=3e-2, rtol=3e-2)), src

    # 4) two-stage fallback path (large-volume path) vs reference
    p = jax.random.normal(jax.random.PRNGKey(1), (2, n_classes, 8, 8, 8),
                          dtype=jnp.float32)
    got_two = trilinear_interpolate(p, patch_size, force_two_stage=True)
    ref_two = _trilinear_reference(p, patch_size)
    assert bool(jnp.allclose(got_two, ref_two, atol=3e-2, rtol=3e-2))

    print("KERNEL_OK")
</pallas_src>

<mosaic_0001>
module attributes {stable_mosaic.version = 11 : i64} {
  func.func @_pointwise_kernel(%arg0: i32, %arg1: i32, %arg2: memref<2x2xf32, #tpu.memory_space<smem>>, %arg3: memref<2xf32, #tpu.memory_space<smem>>, %arg4: memref<1x1x1x512xf32, #tpu.memory_space<vmem>>, %arg5: memref<1x1x1x512xf32, #tpu.memory_space<vmem>>, %arg6: memref<1x2x1x512xf32, #tpu.memory_space<vmem>>) attributes {dimension_semantics = [#tpu.dimension_semantics<parallel>, #tpu.dimension_semantics<parallel>], iteration_bounds = array<i64: 2, 1>, scalar_prefetch = 0 : i64, scratch_operands = 0 : i64, tpu.core_type = #tpu.core_type<tc>, window_params = [{transform_indices = @transform_0, window_bounds = array<i64: 2, 2>}, {transform_indices = @transform_1, window_bounds = array<i64: 2>}, {transform_indices = @transform_2, window_bounds = array<i64: 1, 1, 1, 512>}, {transform_indices = @transform_3, window_bounds = array<i64: 1, 1, 1, 512>}, {transform_indices = @transform_4, window_bounds = array<i64: 1, 2, 1, 512>}]} {
    %c0 = arith.constant 0 : index
    %0 = memref.load %arg3[%c0] : memref<2xf32, #tpu.memory_space<smem>>
    %1 = vector.broadcast %0 : f32 to vector<1x512xf32>
    %c0_0 = arith.constant 0 : index
    %c0_1 = arith.constant 0 : index
    %2 = memref.load %arg2[%c0_0, %c0_1] : memref<2x2xf32, #tpu.memory_space<smem>>
    %c0_2 = arith.constant 0 : index
    %c0_3 = arith.constant 0 : index
    %c0_4 = arith.constant 0 : index
    %c0_5 = arith.constant 0 : index
    %3 = vector.load %arg4[%c0_2, %c0_3, %c0_4, %c0_5] : memref<1x1x1x512xf32, #tpu.memory_space<vmem>>, vector<1x1x1x512xf32>
    %4 = vector.shape_cast %3 : vector<1x1x1x512xf32> to vector<1x512xf32>
    %5 = vector.broadcast %2 : f32 to vector<1x512xf32>
    %6 = arith.mulf %5, %4 : vector<1x512xf32>
    %7 = arith.addf %1, %6 : vector<1x512xf32>
    %c1 = arith.constant 1 : index
    %c0_6 = arith.constant 0 : index
    %8 = memref.load %arg2[%c1, %c0_6] : memref<2x2xf32, #tpu.memory_space<smem>>
    %c0_7 = arith.constant 0 : index
    %c0_8 = arith.constant 0 : index
    %c0_9 = arith.constant 0 : index
    %c0_10 = arith.constant 0 : index
    %9 = vector.load %arg5[%c0_7, %c0_8, %c0_9, %c0_10] : memref<1x1x1x512xf32, #tpu.memory_space<vmem>>, vector<1x1x1x512xf32>
    %10 = vector.shape_cast %9 : vector<1x1x1x512xf32> to vector<1x512xf32>
    %11 = vector.broadcast %8 : f32 to vector<1x512xf32>
    %12 = arith.mulf %11, %10 : vector<1x512xf32>
    %13 = arith.addf %7, %12 : vector<1x512xf32>
    %c0_11 = arith.constant 0 : index
    %c0_12 = arith.constant 0 : index
    %c0_13 = arith.constant 0 : index
    %c0_14 = arith.constant 0 : index
    %14 = vector.load %arg6[%c0_11, %c0_12, %c0_13, %c0_14] : memref<1x2x1x512xf32, #tpu.memory_space<vmem>>, vector<1x1x1x512xf32>
    %15 = vector.shape_cast %14 : vector<1x1x1x512xf32> to vector<1x512xf32>
    %16 = vector.shape_cast %13 : vector<1x512xf32> to vector<1x1x1x512xf32>
    tpu.vector_store %arg6[%c0_11, %c0_12, %c0_13, %c0_14], %16 {strides = array<i32>} : memref<1x2x1x512xf32, #tpu.memory_space<vmem>>, vector<1x1x1x512xf32>,
    %c1_15 = arith.constant 1 : index
    %17 = memref.load %arg3[%c1_15] : memref<2xf32, #tpu.memory_space<smem>>
    %18 = vector.broadcast %17 : f32 to vector<1x512xf32>
    %c0_16 = arith.constant 0 : index
    %c1_17 = arith.constant 1 : index
    %19 = memref.load %arg2[%c0_16, %c1_17] : memref<2x2xf32, #tpu.memory_space<smem>>
    %c0_18 = arith.constant 0 : index
    %c0_19 = arith.constant 0 : index
    %c0_20 = arith.constant 0 : index
    %c0_21 = arith.constant 0 : index
    %20 = vector.load %arg4[%c0_18, %c0_19, %c0_20, %c0_21] : memref<1x1x1x512xf32, #tpu.memory_space<vmem>>, vector<1x1x1x512xf32>
    %21 = vector.shape_cast %20 : vector<1x1x1x512xf32> to vector<1x512xf32>
    %22 = vector.broadcast %19 : f32 to vector<1x512xf32>
    %23 = arith.mulf %22, %21 : vector<1x512xf32>
    %24 = arith.addf %18, %23 : vector<1x512xf32>
    %c1_22 = arith.constant 1 : index
    %c1_23 = arith.constant 1 : index
    %25 = memref.load %arg2[%c1_22, %c1_23] : memref<2x2xf32, #tpu.memory_space<smem>>
    %c0_24 = arith.constant 0 : index
    %c0_25 = arith.constant 0 : index
    %c0_26 = arith.constant 0 : index
    %c0_27 = arith.constant 0 : index
    %26 = vector.load %arg5[%c0_24, %c0_25, %c0_26, %c0_27] : memref<1x1x1x512xf32, #tpu.memory_space<vmem>>, vector<1x1x1x512xf32>
    %27 = vector.shape_cast %26 : vector<1x1x1x512xf32> to vector<1x512xf32>
    %28 = vector.broadcast %25 : f32 to vector<1x512xf32>
    %29 = arith.mulf %28, %27 : vector<1x512xf32>
    %30 = arith.addf %24, %29 : vector<1x512xf32>
    %c0_28 = arith.constant 0 : index
    %c1_29 = arith.constant 1 : index
    %c0_30 = arith.constant 0 : index
    %c0_31 = arith.constant 0 : index
    %31 = vector.load %arg6[%c0_28, %c1_29, %c0_30, %c0_31] : memref<1x2x1x512xf32, #tpu.memory_space<vmem>>, vector<1x1x1x512xf32>
    %32 = vector.shape_cast %31 : vector<1x1x1x512xf32> to vector<1x512xf32>
    %33 = vector.shape_cast %30 : vector<1x512xf32> to vector<1x1x1x512xf32>
    tpu.vector_store %arg6[%c0_28, %c1_29, %c0_30, %c0_31], %33 {strides = array<i32>} : memref<1x2x1x512xf32, #tpu.memory_space<vmem>>, vector<1x1x1x512xf32>,
    return
  }
  func.func @transform_0(%arg0: i32, %arg1: i32) -> (i32, i32) {
    %c0_i32 = arith.constant 0 : i32
    %c0_i32_0 = arith.constant 0 : i32
    %c0_i32_1 = arith.constant 0 : i32
    return %c0_i32, %c0_i32_0 : i32, i32
  }
  func.func @transform_1(%arg0: i32, %arg1: i32) -> i32 {
    %c0_i32 = arith.constant 0 : i32
    %c0_i32_0 = arith.constant 0 : i32
    return %c0_i32 : i32
  }
  func.func @transform_2(%arg0: i32, %arg1: i32) -> (i32, i32, i32, i32) {
    %c0_i32 = arith.constant 0 : i32
    %c0_i32_0 = arith.constant 0 : i32
    %c0_i32_1 = arith.constant 0 : i32
    return %arg0, %c0_i32, %arg1, %c0_i32_0 : i32, i32, i32, i32
  }
  func.func @transform_3(%arg0: i32, %arg1: i32) -> (i32, i32, i32, i32) {
    %c0_i32 = arith.constant 0 : i32
    %c0_i32_0 = arith.constant 0 : i32
    %c0_i32_1 = arith.constant 0 : i32
    return %arg0, %c0_i32, %arg1, %c0_i32_0 : i32, i32, i32, i32
  }
  func.func @transform_4(%arg0: i32, %arg1: i32) -> (i32, i32, i32, i32) {
    %c0_i32 = arith.constant 0 : i32
    %c0_i32_0 = arith.constant 0 : i32
    %c0_i32_1 = arith.constant 0 : i32
    return %arg0, %c0_i32, %arg1, %c0_i32_0 : i32, i32, i32, i32
  }
}

module attributes {stable_mosaic.version = 11 : i64} {
  func.func @_interp_kron_kernel(%arg0: i32, %arg1: memref<16x64xbf16, #tpu.memory_space<vmem>>, %arg2: memref<64x256xbf16, #tpu.memory_space<vmem>>, %arg3: memref<32x16xbf16, #tpu.memory_space<vmem>>, %arg4: memref<32x256xf32, #tpu.memory_space<vmem>>) attributes {dimension_semantics = [#tpu.dimension_semantics<parallel>], iteration_bounds = array<i64: 2>, scalar_prefetch = 0 : i64, scratch_operands = 0 : i64, tpu.core_type = #tpu.core_type<tc>, window_params = [{transform_indices = @transform_0, window_bounds = array<i64: 16, 64>}, {pipeline_mode = #tpu.pipeline_mode<synchronous>, transform_indices = @transform_1, window_bounds = array<i64: 64, 256>}, {pipeline_mode = #tpu.pipeline_mode<synchronous>, transform_indices = @transform_2, window_bounds = array<i64: 32, 16>}, {transform_indices = @transform_3, window_bounds = array<i64: 32, 256>}]} {
    %c0 = arith.constant 0 : index
    %c0_0 = arith.constant 0 : index
    %0 = vector.load %arg1[%c0, %c0_0] : memref<16x64xbf16, #tpu.memory_space<vmem>>, vector<16x64xbf16>
    %c0_1 = arith.constant 0 : index
    %c0_2 = arith.constant 0 : index
    %1 = vector.load %arg2[%c0_1, %c0_2] : memref<64x256xbf16, #tpu.memory_space<vmem>>, vector<64x256xbf16>
    %cst = arith.constant dense<0.000000e+00> : vector<16x256xf32>
    %2 = tpu.matmul %0, %1, %cst {dimension_numbers = #tpu.dot_dimension_numbers<[1], [0], [0], [1], [0, 0, 1, 1], [], []>} : vector<16x64xbf16>, vector<64x256xbf16>, vector<16x256xf32> -> vector<16x256xf32>
    %c0_3 = arith.constant 0 : index
    %c0_4 = arith.constant 0 : index
    %3 = vector.load %arg3[%c0_3, %c0_4] : memref<32x16xbf16, #tpu.memory_space<vmem>>, vector<32x16xbf16>
    %4 = arith.truncf %2 : vector<16x256xf32> to vector<16x256xbf16>
    %cst_5 = arith.constant dense<0.000000e+00> : vector<32x256xf32>
    %5 = tpu.matmul %3, %4, %cst_5 {dimension_numbers = #tpu.dot_dimension_numbers<[1], [0], [0], [1], [0, 0, 1, 1], [], []>} : vector<32x16xbf16>, vector<16x256xbf16>, vector<32x256xf32> -> vector<32x256xf32>
    %c0_6 = arith.constant 0 : index
    %c0_7 = arith.constant 0 : index
    %6 = vector.load %arg4[%c0_6, %c0_7] : memref<32x256xf32, #tpu.memory_space<vmem>>, vector<32x256xf32>
    tpu.vector_store %arg4[%c0_6, %c0_7], %5 {strides = array<i32>} : memref<32x256xf32, #tpu.memory_space<vmem>>, vector<32x256xf32>,
    return
  }
  func.func @transform_0(%arg0: i32) -> (i32, i32) {
    %c0_i32 = arith.constant 0 : i32
    %c0_i32_0 = arith.constant 0 : i32
    return %arg0, %c0_i32 : i32, i32
  }
  func.func @transform_1(%arg0: i32) -> (i32, i32) {
    %c0_i32 = arith.constant 0 : i32
    %c0_i32_0 = arith.constant 0 : i32
    %c0_i32_1 = arith.constant 0 : i32
    return %c0_i32, %c0_i32_0 : i32, i32
  }
  func.func @transform_2(%arg0: i32) -> (i32, i32) {
    %c0_i32 = arith.constant 0 : i32
    %c0_i32_0 = arith.constant 0 : i32
    %c0_i32_1 = arith.constant 0 : i32
    return %c0_i32, %c0_i32_0 : i32, i32
  }
  func.func @transform_3(%arg0: i32) -> (i32, i32) {
    %c0_i32 = arith.constant 0 : i32
    %c0_i32_0 = arith.constant 0 : i32
    return %arg0, %c0_i32 : i32, i32
  }
}

module attributes {stable_mosaic.version = 11 : i64} {
  func.func @_interp_kron_kernel(%arg0: i32, %arg1: memref<8x16xbf16, #tpu.memory_space<vmem>>, %arg2: memref<16x256xbf16, #tpu.memory_space<vmem>>, %arg3: memref<32x8xbf16, #tpu.memory_space<vmem>>, %arg4: memref<32x256xf32, #tpu.memory_space<vmem>>) attributes {dimension_semantics = [#tpu.dimension_semantics<parallel>], iteration_bounds = array<i64: 2>, scalar_prefetch = 0 : i64, scratch_operands = 0 : i64, tpu.core_type = #tpu.core_type<tc>, window_params = [{transform_indices = @transform_0, window_bounds = array<i64: 8, 16>}, {pipeline_mode = #tpu.pipeline_mode<synchronous>, transform_indices = @transform_1, window_bounds = array<i64: 16, 256>}, {pipeline_mode = #tpu.pipeline_mode<synchronous>, transform_indices = @transform_2, window_bounds = array<i64: 32, 8>}, {transform_indices = @transform_3, window_bounds = array<i64: 32, 256>}]} {
    %c0 = arith.constant 0 : index
    %c0_0 = arith.constant 0 : index
    %0 = vector.load %arg1[%c0, %c0_0] : memref<8x16xbf16, #tpu.memory_space<vmem>>, vector<8x16xbf16>
    %c0_1 = arith.constant 0 : index
    %c0_2 = arith.constant 0 : index
    %1 = vector.load %arg2[%c0_1, %c0_2] : memref<16x256xbf16, #tpu.memory_space<vmem>>, vector<16x256xbf16>
    %cst = arith.constant dense<0.000000e+00> : vector<8x256xf32>
    %2 = tpu.matmul %0, %1, %cst {dimension_numbers = #tpu.dot_dimension_numbers<[1], [0], [0], [1], [0, 0, 1, 1], [], []>} : vector<8x16xbf16>, vector<16x256xbf16>, vector<8x256xf32> -> vector<8x256xf32>
    %c0_3 = arith.constant 0 : index
    %c0_4 = arith.constant 0 : index
    %3 = vector.load %arg3[%c0_3, %c0_4] : memref<32x8xbf16, #tpu.memory_space<vmem>>, vector<32x8xbf16>
    %4 = arith.truncf %2 : vector<8x256xf32> to vector<8x256xbf16>
    %cst_5 = arith.constant dense<0.000000e+00> : vector<32x256xf32>
    %5 = tpu.matmul %3, %4, %cst_5 {dimension_numbers = #tpu.dot_dimension_numbers<[1], [0], [0], [1], [0, 0, 1, 1], [], []>} : vector<32x8xbf16>, vector<8x256xbf16>, vector<32x256xf32> -> vector<32x256xf32>
    %c0_6 = arith.constant 0 : index
    %c0_7 = arith.constant 0 : index
    %6 = vector.load %arg4[%c0_6, %c0_7] : memref<32x256xf32, #tpu.memory_space<vmem>>, vector<32x256xf32>
    tpu.vector_store %arg4[%c0_6, %c0_7], %5 {strides = array<i32>} : memref<32x256xf32, #tpu.memory_space<vmem>>, vector<32x256xf32>,
    return
  }
  func.func @transform_0(%arg0: i32) -> (i32, i32) {
    %c0_i32 = arith.constant 0 : i32
    %c0_i32_0 = arith.constant 0 : i32
    return %arg0, %c0_i32 : i32, i32
  }
  func.func @transform_1(%arg0: i32) -> (i32, i32) {
    %c0_i32 = arith.constant 0 : i32
    %c0_i32_0 = arith.constant 0 : i32
    %c0_i32_1 = arith.constant 0 : i32
    return %c0_i32, %c0_i32_0 : i32, i32
  }
  func.func @transform_2(%arg0: i32) -> (i32, i32) {
    %c0_i32 = arith.constant 0 : i32
    %c0_i32_0 = arith.constant 0 : i32
    %c0_i32_1 = arith.constant 0 : i32
    return %c0_i32, %c0_i32_0 : i32, i32
  }
  func.func @transform_3(%arg0: i32) -> (i32, i32) {
    %c0_i32 = arith.constant 0 : i32
    %c0_i32_0 = arith.constant 0 : i32
    return %arg0, %c0_i32 : i32, i32
  }
}

module attributes {stable_mosaic.version = 11 : i64} {
  func.func @_interp_kron_kernel(%arg0: i32, %arg1: memref<8x4xbf16, #tpu.memory_space<vmem>>, %arg2: memref<4x256xbf16, #tpu.memory_space<vmem>>, %arg3: memref<64x8xbf16, #tpu.memory_space<vmem>>, %arg4: memref<64x256xf32, #tpu.memory_space<vmem>>) attributes {dimension_semantics = [#tpu.dimension_semantics<parallel>], iteration_bounds = array<i64: 1>, scalar_prefetch = 0 : i64, scratch_operands = 0 : i64, tpu.core_type = #tpu.core_type<tc>, window_params = [{transform_indices = @transform_0, window_bounds = array<i64: 8, 4>}, {pipeline_mode = #tpu.pipeline_mode<synchronous>, transform_indices = @transform_1, window_bounds = array<i64: 4, 256>}, {pipeline_mode = #tpu.pipeline_mode<synchronous>, transform_indices = @transform_2, window_bounds = array<i64: 64, 8>}, {transform_indices = @transform_3, window_bounds = array<i64: 64, 256>}]} {
    %c0 = arith.constant 0 : index
    %c0_0 = arith.constant 0 : index
    %0 = vector.load %arg1[%c0, %c0_0] : memref<8x4xbf16, #tpu.memory_space<vmem>>, vector<8x4xbf16>
    %c0_1 = arith.constant 0 : index
    %c0_2 = arith.constant 0 : index
    %1 = vector.load %arg2[%c0_1, %c0_2] : memref<4x256xbf16, #tpu.memory_space<vmem>>, vector<4x256xbf16>
    %cst = arith.constant dense<0.000000e+00> : vector<8x256xf32>
    %2 = tpu.matmul %0, %1, %cst {dimension_numbers = #tpu.dot_dimension_numbers<[1], [0], [0], [1], [0, 0, 1, 1], [], []>} : vector<8x4xbf16>, vector<4x256xbf16>, vector<8x256xf32> -> vector<8x256xf32>
    %c0_3 = arith.constant 0 : index
    %c0_4 = arith.constant 0 : index
    %3 = vector.load %arg3[%c0_3, %c0_4] : memref<64x8xbf16, #tpu.memory_space<vmem>>, vector<64x8xbf16>
    %4 = arith.truncf %2 : vector<8x256xf32> to vector<8x256xbf16>
    %cst_5 = arith.constant dense<0.000000e+00> : vector<64x256xf32>
    %5 = tpu.matmul %3, %4, %cst_5 {dimension_numbers = #tpu.dot_dimension_numbers<[1], [0], [0], [1], [0, 0, 1, 1], [], []>} : vector<64x8xbf16>, vector<8x256xbf16>, vector<64x256xf32> -> vector<64x256xf32>
    %c0_6 = arith.constant 0 : index
    %c0_7 = arith.constant 0 : index
    %6 = vector.load %arg4[%c0_6, %c0_7] : memref<64x256xf32, #tpu.memory_space<vmem>>, vector<64x256xf32>
    tpu.vector_store %arg4[%c0_6, %c0_7], %5 {strides = array<i32>} : memref<64x256xf32, #tpu.memory_space<vmem>>, vector<64x256xf32>,
    return
  }
  func.func @transform_0(%arg0: i32) -> (i32, i32) {
    %c0_i32 = arith.constant 0 : i32
    %c0_i32_0 = arith.constant 0 : i32
    return %arg0, %c0_i32 : i32, i32
  }
  func.func @transform_1(%arg0: i32) -> (i32, i32) {
    %c0_i32 = arith.constant 0 : i32
    %c0_i32_0 = arith.constant 0 : i32
    %c0_i32_1 = arith.constant 0 : i32
    return %c0_i32, %c0_i32_0 : i32, i32
  }
  func.func @transform_2(%arg0: i32) -> (i32, i32) {
    %c0_i32 = arith.constant 0 : i32
    %c0_i32_0 = arith.constant 0 : i32
    %c0_i32_1 = arith.constant 0 : i32
    return %c0_i32, %c0_i32_0 : i32, i32
  }
  func.func @transform_3(%arg0: i32) -> (i32, i32) {
    %c0_i32 = arith.constant 0 : i32
    %c0_i32_0 = arith.constant 0 : i32
    return %arg0, %c0_i32 : i32, i32
  }
}

module attributes {stable_mosaic.version = 11 : i64} {
  func.func @_interp_kron_kernel(%arg0: i32, %arg1: memref<4x1xbf16, #tpu.memory_space<vmem>>, %arg2: memref<1x256xbf16, #tpu.memory_space<vmem>>, %arg3: memref<64x4xbf16, #tpu.memory_space<vmem>>, %arg4: memref<64x256xf32, #tpu.memory_space<vmem>>) attributes {dimension_semantics = [#tpu.dimension_semantics<parallel>], iteration_bounds = array<i64: 1>, scalar_prefetch = 0 : i64, scratch_operands = 0 : i64, tpu.core_type = #tpu.core_type<tc>, window_params = [{transform_indices = @transform_0, window_bounds = array<i64: 4, 1>}, {pipeline_mode = #tpu.pipeline_mode<synchronous>, transform_indices = @transform_1, window_bounds = array<i64: 1, 256>}, {pipeline_mode = #tpu.pipeline_mode<synchronous>, transform_indices = @transform_2, window_bounds = array<i64: 64, 4>}, {transform_indices = @transform_3, window_bounds = array<i64: 64, 256>}]} {
    %c0 = arith.constant 0 : index
    %c0_0 = arith.constant 0 : index
    %0 = vector.load %arg1[%c0, %c0_0] : memref<4x1xbf16, #tpu.memory_space<vmem>>, vector<4x1xbf16>
    %c0_1 = arith.constant 0 : index
    %c0_2 = arith.constant 0 : index
    %1 = vector.load %arg2[%c0_1, %c0_2] : memref<1x256xbf16, #tpu.memory_space<vmem>>, vector<1x256xbf16>
    %cst = arith.constant dense<0.000000e+00> : vector<4x256xf32>
    %2 = tpu.matmul %0, %1, %cst {dimension_numbers = #tpu.dot_dimension_numbers<[1], [0], [0], [1], [0, 0, 1, 1], [], []>} : vector<4x1xbf16>, vector<1x256xbf16>, vector<4x256xf32> -> vector<4x256xf32>
    %c0_3 = arith.constant 0 : index
    %c0_4 = arith.constant 0 : index
    %3 = vector.load %arg3[%c0_3, %c0_4] : memref<64x4xbf16, #tpu.memory_space<vmem>>, vector<64x4xbf16>
    %4 = arith.truncf %2 : vector<4x256xf32> to vector<4x256xbf16>
    %cst_5 = arith.constant dense<0.000000e+00> : vector<64x256xf32>
    %5 = tpu.matmul %3, %4, %cst_5 {dimension_numbers = #tpu.dot_dimension_numbers<[1], [0], [0], [1], [0, 0, 1, 1], [], []>} : vector<64x4xbf16>, vector<4x256xbf16>, vector<64x256xf32> -> vector<64x256xf32>
    %c0_6 = arith.constant 0 : index
    %c0_7 = arith.constant 0 : index
    %6 = vector.load %arg4[%c0_6, %c0_7] : memref<64x256xf32, #tpu.memory_space<vmem>>, vector<64x256xf32>
    tpu.vector_store %arg4[%c0_6, %c0_7], %5 {strides = array<i32>} : memref<64x256xf32, #tpu.memory_space<vmem>>, vector<64x256xf32>,
    return
  }
  func.func @transform_0(%arg0: i32) -> (i32, i32) {
    %c0_i32 = arith.constant 0 : i32
    %c0_i32_0 = arith.constant 0 : i32
    return %arg0, %c0_i32 : i32, i32
  }
  func.func @transform_1(%arg0: i32) -> (i32, i32) {
    %c0_i32 = arith.constant 0 : i32
    %c0_i32_0 = arith.constant 0 : i32
    %c0_i32_1 = arith.constant 0 : i32
    return %c0_i32, %c0_i32_0 : i32, i32
  }
  func.func @transform_2(%arg0: i32) -> (i32, i32) {
    %c0_i32 = arith.constant 0 : i32
    %c0_i32_0 = arith.constant 0 : i32
    %c0_i32_1 = arith.constant 0 : i32
    return %c0_i32, %c0_i32_0 : i32, i32
  }
  func.func @transform_3(%arg0: i32) -> (i32, i32) {
    %c0_i32 = arith.constant 0 : i32
    %c0_i32_0 = arith.constant 0 : i32
    return %arg0, %c0_i32 : i32, i32
  }
}

module attributes {stable_mosaic.version = 11 : i64} {
  func.func @_pointwise_kernel(%arg0: i32, %arg1: i32, %arg2: memref<2x2xf32, #tpu.memory_space<smem>>, %arg3: memref<2xf32, #tpu.memory_space<smem>>, %arg4: memref<1x1x2x2048xf32, #tpu.memory_space<vmem>>, %arg5: memref<1x1x2x2048xf32, #tpu.memory_space<vmem>>, %arg6: memref<1x2x2x2048xf32, #tpu.memory_space<vmem>>) attributes {dimension_semantics = [#tpu.dimension_semantics<parallel>, #tpu.dimension_semantics<parallel>], iteration_bounds = array<i64: 2, 1>, scalar_prefetch = 0 : i64, scratch_operands = 0 : i64, tpu.core_type = #tpu.core_type<tc>, window_params = [{transform_indices = @transform_0, window_bounds = array<i64: 2, 2>}, {transform_indices = @transform_1, window_bounds = array<i64: 2>}, {transform_indices = @transform_2, window_bounds = array<i64: 1, 1, 2, 2048>}, {transform_indices = @transform_3, window_bounds = array<i64: 1, 1, 2, 2048>}, {transform_indices = @transform_4, window_bounds = array<i64: 1, 2, 2, 2048>}]} {
    %c0 = arith.constant 0 : index
    %0 = memref.load %arg3[%c0] : memref<2xf32, #tpu.memory_space<smem>>
    %1 = vector.broadcast %0 : f32 to vector<2x2048xf32>
    %c0_0 = arith.constant 0 : index
    %c0_1 = arith.constant 0 : index
    %2 = memref.load %arg2[%c0_0, %c0_1] : memref<2x2xf32, #tpu.memory_space<smem>>
    %c0_2 = arith.constant 0 : index
    %c0_3 = arith.constant 0 : index
    %c0_4 = arith.constant 0 : index
    %c0_5 = arith.constant 0 : index
    %3 = vector.load %arg4[%c0_2, %c0_3, %c0_4, %c0_5] : memref<1x1x2x2048xf32, #tpu.memory_space<vmem>>, vector<1x1x2x2048xf32>
    %4 = vector.shape_cast %3 : vector<1x1x2x2048xf32> to vector<2x2048xf32>
    %5 = vector.broadcast %2 : f32 to vector<2x2048xf32>
    %6 = arith.mulf %5, %4 : vector<2x2048xf32>
    %7 = arith.addf %1, %6 : vector<2x2048xf32>
    %c1 = arith.constant 1 : index
    %c0_6 = arith.constant 0 : index
    %8 = memref.load %arg2[%c1, %c0_6] : memref<2x2xf32, #tpu.memory_space<smem>>
    %c0_7 = arith.constant 0 : index
    %c0_8 = arith.constant 0 : index
    %c0_9 = arith.constant 0 : index
    %c0_10 = arith.constant 0 : index
    %9 = vector.load %arg5[%c0_7, %c0_8, %c0_9, %c0_10] : memref<1x1x2x2048xf32, #tpu.memory_space<vmem>>, vector<1x1x2x2048xf32>
    %10 = vector.shape_cast %9 : vector<1x1x2x2048xf32> to vector<2x2048xf32>
    %11 = vector.broadcast %8 : f32 to vector<2x2048xf32>
    %12 = arith.mulf %11, %10 : vector<2x2048xf32>
    %13 = arith.addf %7, %12 : vector<2x2048xf32>
    %c0_11 = arith.constant 0 : index
    %c0_12 = arith.constant 0 : index
    %c0_13 = arith.constant 0 : index
    %c0_14 = arith.constant 0 : index
    %14 = vector.load %arg6[%c0_11, %c0_12, %c0_13, %c0_14] : memref<1x2x2x2048xf32, #tpu.memory_space<vmem>>, vector<1x1x2x2048xf32>
    %15 = vector.shape_cast %14 : vector<1x1x2x2048xf32> to vector<2x2048xf32>
    %16 = vector.shape_cast %13 : vector<2x2048xf32> to vector<1x1x2x2048xf32>
    tpu.vector_store %arg6[%c0_11, %c0_12, %c0_13, %c0_14], %16 {strides = array<i32>} : memref<1x2x2x2048xf32, #tpu.memory_space<vmem>>, vector<1x1x2x2048xf32>,
    %c1_15 = arith.constant 1 : index
    %17 = memref.load %arg3[%c1_15] : memref<2xf32, #tpu.memory_space<smem>>
    %18 = vector.broadcast %17 : f32 to vector<2x2048xf32>
    %c0_16 = arith.constant 0 : index
    %c1_17 = arith.constant 1 : index
    %19 = memref.load %arg2[%c0_16, %c1_17] : memref<2x2xf32, #tpu.memory_space<smem>>
    %c0_18 = arith.constant 0 : index
    %c0_19 = arith.constant 0 : index
    %c0_20 = arith.constant 0 : index
    %c0_21 = arith.constant 0 : index
    %20 = vector.load %arg4[%c0_18, %c0_19, %c0_20, %c0_21] : memref<1x1x2x2048xf32, #tpu.memory_space<vmem>>, vector<1x1x2x2048xf32>
    %21 = vector.shape_cast %20 : vector<1x1x2x2048xf32> to vector<2x2048xf32>
    %22 = vector.broadcast %19 : f32 to vector<2x2048xf32>
    %23 = arith.mulf %22, %21 : vector<2x2048xf32>
    %24 = arith.addf %18, %23 : vector<2x2048xf32>
    %c1_22 = arith.constant 1 : index
    %c1_23 = arith.constant 1 : index
    %25 = memref.load %arg2[%c1_22, %c1_23] : memref<2x2xf32, #tpu.memory_space<smem>>
    %c0_24 = arith.constant 0 : index
    %c0_25 = arith.constant 0 : index
    %c0_26 = arith.constant 0 : index
    %c0_27 = arith.constant 0 : index
    %26 = vector.load %arg5[%c0_24, %c0_25, %c0_26, %c0_27] : memref<1x1x2x2048xf32, #tpu.memory_space<vmem>>, vector<1x1x2x2048xf32>
    %27 = vector.shape_cast %26 : vector<1x1x2x2048xf32> to vector<2x2048xf32>
    %28 = vector.broadcast %25 : f32 to vector<2x2048xf32>
    %29 = arith.mulf %28, %27 : vector<2x2048xf32>
    %30 = arith.addf %24, %29 : vector<2x2048xf32>
    %c0_28 = arith.constant 0 : index
    %c1_29 = arith.constant 1 : index
    %c0_30 = arith.constant 0 : index
    %c0_31 = arith.constant 0 : index
    %31 = vector.load %arg6[%c0_28, %c1_29, %c0_30, %c0_31] : memref<1x2x2x2048xf32, #tpu.memory_space<vmem>>, vector<1x1x2x2048xf32>
    %32 = vector.shape_cast %31 : vector<1x1x2x2048xf32> to vector<2x2048xf32>
    %33 = vector.shape_cast %30 : vector<2x2048xf32> to vector<1x1x2x2048xf32>
    tpu.vector_store %arg6[%c0_28, %c1_29, %c0_30, %c0_31], %33 {strides = array<i32>} : memref<1x2x2x2048xf32, #tpu.memory_space<vmem>>, vector<1x1x2x2048xf32>,
    return
  }
  func.func @transform_0(%arg0: i32, %arg1: i32) -> (i32, i32) {
    %c0_i32 = arith.constant 0 : i32
    %c0_i32_0 = arith.constant 0 : i32
    %c0_i32_1 = arith.constant 0 : i32
    return %c0_i32, %c0_i32_0 : i32, i32
  }
  func.func @transform_1(%arg0: i32, %arg1: i32) -> i32 {
    %c0_i32 = arith.constant 0 : i32
    %c0_i32_0 = arith.constant 0 : i32
    return %c0_i32 : i32
  }
  func.func @transform_2(%arg0: i32, %arg1: i32) -> (i32, i32, i32, i32) {
    %c0_i32 = arith.constant 0 : i32
    %c0_i32_0 = arith.constant 0 : i32
    %c0_i32_1 = arith.constant 0 : i32
    return %arg0, %c0_i32, %arg1, %c0_i32_0 : i32, i32, i32, i32
  }
  func.func @transform_3(%arg0: i32, %arg1: i32) -> (i32, i32, i32, i32) {
    %c0_i32 = arith.constant 0 : i32
    %c0_i32_0 = arith.constant 0 : i32
    %c0_i32_1 = arith.constant 0 : i32
    return %arg0, %c0_i32, %arg1, %c0_i32_0 : i32, i32, i32, i32
  }
  func.func @transform_4(%arg0: i32, %arg1: i32) -> (i32, i32, i32, i32) {
    %c0_i32 = arith.constant 0 : i32
    %c0_i32_0 = arith.constant 0 : i32
    %c0_i32_1 = arith.constant 0 : i32
    return %arg0, %c0_i32, %arg1, %c0_i32_0 : i32, i32, i32, i32
  }
}

</mosaic_0001>

<bundles_post_ra>
// kernel: h2aseg_forward.7
= control target key start
LH: loop header
LB: loop body
LE: loop exit
PB: predicated region body
PF: predicated region fallthrough
CT: control target
= control target key end

     0   :  { %9 = vsyncpa [#allocation3], 0  ;;  %s656_s0 = inlined_call_operand.vmem [shape: f32[2,2], index: 0, kind: input, shape index: {}]   ;;  %s657_s1 = inlined_call_operand.vmem [shape: f32[2], index: 1, kind: input, shape index: {}]   ;;  %s658_s2 = inlined_call_operand.vmem [shape: f32[2,1,1,512], index: 2, kind: input, shape index: {}]   ;;  %s659_s3 = inlined_call_operand.vmem [shape: f32[2,1,1,512], index: 3, kind: input, shape index: {}]   ;;  %s660_s4 = inlined_call_operand.vmem [shape: f32[2,2,1,512], index: 4, kind: output, shape index: {}]  }
   0x1   :  { %10 = vsyncpa [#allocation5], 0  ;;  %s595_s15 = smov 0   ;;  %s597_s16 = smov 0  }
   0x2   :  { %s599_s17 = smov 0  }
   0x3 LB: > { %s442_s18 = sadd.s32 4294967295, %s566_s17   ;;  %s28_s19 = sadd.s32 1, %s562_s16  ;;  %s566_s17 = sphi %s599_s17, %s16_s17   ;;  %s562_s16 = sphi %s597_s16, %s663_s16   ;;  %s558_s15 = sphi %s595_s15, %s662_s15  }
   0x4   : > { %p30_p0 = scmp.ge.s32.totalorder %s28_s19, 2  ;;  %p444_p1 = scmp.ge.s32.totalorder %s566_s17, 1 }
   0x5   : > { %p159_p2 = scmp.lt.s32.totalorder %s566_s17, 3  ;;  %p616_p4 = scmp.eq.s32.totalorder %s442_s18, 0 }
   0x6   : > { %s665_s19 = smov (%p30_p0, %s28_s19), 0  ;;  %s171_s23 = sshll.u32 %s656_s0, 4  ;;  %s172_s23 = int_to_ptr.vmem [resolvable:$true] %s171_s23 }
   0x7   : > { %p160_p3 = pnand %p444_p1, %p159_p2  ;;  %s181_s26 = sshll.u32 %s657_s1, 4  ;;  %s182_s26 = int_to_ptr.vmem [resolvable:$true] %s181_s26 }
   0x8   : > { %s568_s27 = smov [#allocation2]   ;;  %s569_s28 = smov [#allocation4]  }
   0x9   : > { %p469_p5 = pneg %p160_p3 }
   0xa   : > { %216 = sbr.rel (%p160_p3) target bundleno = 39 (0x27), region = 36 }
   0xb   : > { %p470_p6 = pnand %p616_p4, %p469_p5 }
   0xd   : > { %472 = dma.vmem_to_smem (!%p470_p6), %s172_s23, 32, %s568_s27, [#allocation3]  }
   0xe   : > { %475 = dma.vmem_to_smem (!%p470_p6), %s182_s26, 16, %s569_s28, [#allocation5]  }
   0xf   : > { %549 = dma.done.wait (%p616_p4), [#allocation3], 32  }
  0x10   : > { %551 = vsyncadd (%p616_p4), [#allocation3], 4294967264 }
  0x11   : > { %553 = dma.done.wait (%p616_p4), [#allocation5], 16  }
  0x12   : > { %555 = vsyncadd (%p616_p4), [#allocation5], 4294967280 }
  0x13   : > { %228 = sfence }
  0x14   : > { %p263_p7 = scmp.lt.s32.totalorder %s558_s15, 1  ;;  %s287_s29 = sld [smem:[#allocation4]]  ;;  %v299_v4 = vlaneseq }
  0x15   : > { %s289_s30 = sld [smem:[#allocation2]] }
  0x16   : > { %s667_s15 = smov (!%p263_p7, %s558_s15), 1  ;;  %s454_s5 = sld [smem:[#allocation2 + $0x80]]  ;;  %vm301_vm0 = vcmp.lt.s32.totalorder %v299_v4, 512 }
  0x17   : > { %s451_s6 = sshll.u32 %s667_s15, 2  ;;  %s455_s13 = sld [smem:[#allocation4 + $0x1]] }
  0x18   : > { %s270_s9 = scalar_lea.vmem %s658_s2, %s451_s6  ;;  %s278_s12 = scalar_lea.vmem %s659_s3, %s451_s6 }
  0x19   : > { %v290_v0 = vld [vmem:[%s270_s9] sm:$0xf]  ;;  %s453_s14 = sshll.u32 %s667_s15, 3  ;;  %s456_s18 = sld [smem:[#allocation2 + $0x1]] }
  0x1a   : > { %v288_v1 = vstv %s287_s29  ;;  %v295_v3 = vld [vmem:[%s278_s12] sm:$0xf]  ;;  %s457_s20 = sld [smem:[#allocation2 + $0x81]]  ;;  %s286_s23 = scalar_lea.vmem %s660_s4, %s453_s14 }
  0x1b   : > { %v291_v2 = vstv %s289_s30  ;;  %v307_v10 = vld [vmem:[%s270_s9] sm:$0xf] }
  0x1c   : > { %v292_v5 = vmul.f32 %v291_v2, %v290_v0  ;;  %v296_v6 = vstv %s454_s5  ;;  %v312_v11 = vld [vmem:[%s278_s12] sm:$0xf] }
  0x1d   : > { %v297_v8 = vmul.f32 %v296_v6, %v295_v3  ;;  %v305_v12 = vstv %s455_s13 }
  0x1e   : > { %v293_v7 = vadd.f32 %v292_v5, %v288_v1 }
  0x1f   : > { %v308_v13 = vstv %s456_s18 }
  0x20   : > { %v298_v9 = vadd.f32 %v297_v8, %v293_v7  ;;  %v309_v14 = vmul.f32 %v308_v13, %v307_v10  ;;  %v313_v15 = vstv %s457_s20 }
  0x21   : > { %v314_v16 = vmul.f32 %v313_v15, %v312_v11 }
  0x22   : > { %303 = vst.msk [vmem:[%s286_s23] sm:$0xf] %vm301_vm0, %v298_v9  ;;  %v310_v17 = vadd.f32 %v309_v14, %v305_v12 }
  0x24   : > { %v315_v18 = vadd.f32 %v314_v16, %v310_v17 }
  0x26   : > { %458 = vst.msk [vmem:[%s286_s23 + $0x4] sm:$0xf] %vm301_vm0, %v315_v18 }
  0x27 PF: > { %s16_s17 = sadd.s32 1, %s566_s17   ;;  %s662_s15 = smov %s562_s16 }
  0x28   : > { %p13_p8 = scmp.ge.s32.totalorder %s16_s17, 4   ;;  %s663_s16 = smov %s665_s19 }
  0x2a   :  { %15 = sbr.rel (!%p13_p8) target bundleno = 3 (0x3), region = 79 }
  0x2f   :  { %345 = vsyncpa [#allocation3], 1 }
  0x30   :  { %347 = vsyncpa [#allocation3 + $0x1], 1 }
  0x31   :  { %348 = vsyncpa [#allocation5], 1 }

// kernel: h2aseg_forward.8
= control target key start
LH: loop header
LB: loop body
LE: loop exit
PB: predicated region body
PF: predicated region fallthrough
CT: control target
= control target key end

     0   :  { %s501_s12 = smov 0   ;;  %s576_s0 = inlined_call_operand.vmem [shape: bf16[32,64], index: 0, kind: input, shape index: {}]   ;;  %s577_s1 = inlined_call_operand.vmem [shape: bf16[64,256], index: 1, kind: input, shape index: {}]   ;;  %s578_s2 = inlined_call_operand.vmem [shape: bf16[32,16], index: 2, kind: input, shape index: {}]   ;;  %s579_s3 = inlined_call_operand.vmem [shape: f32[64,256], index: 3, kind: output, shape index: {}]  }
   0x1 LB: > { %s391_s13 = sadd.s32 4294967295, %s479_s12   ;;  %p395_p0 = scmp.ge.s32.totalorder %s479_s12, 1  ;;  %s479_s12 = sphi %s501_s12, %s13_s12  }
   0x2   : > { %p138_p1 = scmp.lt.s32.totalorder %s479_s12, 3 }
   0x4   : > { %p139_p2 = pnand %p395_p0, %p138_p1 }
   0x5   : > { %s396_s11 = sshll.u32 (!%p139_p2), %s391_s13, 1  ;;  %s398_s30 = sshll.u32 (!%p139_p2), %s391_s13, 2 }
   0x6   : > { %142 = sbr.rel (%p139_p2) target bundleno = 326 (0x146), region = 32  ;;  %p164_p3 = scmp.lt.s32.totalorder (!%p139_p2), %s396_s11, 3 }
   0x7   : > { %p170_p4 = scmp.lt.s32.totalorder (!%p139_p2), %s398_s30, 7 }
   0xb   : > { %v431_v0 = vld [vmem:[%s577_s1 + $0x30] sm:$0xf]  ;;  %v462_v1 = vld [vmem:[%s577_s1 + $0x34] sm:$0xf0]  ;;  %v461_v2 = vld [vmem:[%s577_s1 + $0x34] sm:$0xf] }
   0xc   : > { %v432_v3 = vor.u32 %v462_v1, %v431_v0  ;;  %v433_v4 = vld [vmem:[%s577_s1 + $0x38] sm:$0xf0]  ;;  %v423_v5 = vld [vmem:[%s577_s1 + $0x20] sm:$0xf]  ;;  %v460_v6 = vld [vmem:[%s577_s1 + $0x24] sm:$0xf0] }
   0xd   : > { %v436_v7 = vor.u32 %v461_v2, %v433_v4  ;;  %v459_v8 = vld [vmem:[%s577_s1 + $0x24] sm:$0xf]  ;;  %v425_v9 = vld [vmem:[%s577_s1 + $0x28] sm:$0xf0]  ;;  %v424_v10 = vor.u32 %v460_v6, %v423_v5  ;;  %v415_v12 = vld [vmem:[%s577_s1 + $0x10] sm:$0xf] }
   0xe   : > { %240 = vmatpush.bf16.msra.mxu0 %v432_v3  ;;  %v428_v11 = vor.u32 %v459_v8, %v425_v9  ;;  %v458_v13 = vld [vmem:[%s577_s1 + $0x14] sm:$0xf0]  ;;  %v457_v14 = vld [vmem:[%s577_s1 + $0x14] sm:$0xf]  ;;  %v417_v15 = vld [vmem:[%s577_s1 + $0x18] sm:$0xf0] }
   0xf   : > { %254 = vmatpush.bf16.msra.mxu1 %v436_v7  ;;  %v416_v16 = vor.u32 %v458_v13, %v415_v12  ;;  %v420_v17 = vor.u32 %v457_v14, %v417_v15  ;;  %v407_v18 = vld [vmem:[%s577_s1] sm:$0xf]  ;;  %v456_v19 = vld [vmem:[%s577_s1 + $0x4] sm:$0xf0]  ;;  %s581_s11 = smov (!%p164_p3, %s396_s11), 3  ;;  %vm232_vm0 = vcmask 523264  }
  0x10   : > { %v455_v20 = vld [vmem:[%s577_s1 + $0x4] sm:$0xf]  ;;  %v409_v21 = vld [vmem:[%s577_s1 + $0x8] sm:$0xf0]  ;;  %s397_s22 = sshll.u32 %s581_s11, 2  ;;  %v408_v22 = vor.u32 %v456_v19, %v407_v18  ;;  %vm280_vm1 = vcmask 130048  }
  0x11   : > { %s167_s25 = scalar_lea.vmem %s576_s0, %s397_s22  ;;  %v412_v23 = vor.u32 %v455_v20, %v409_v21  ;;  %v463_v31 = vld [vmem:[%s578_s2] sm:$0xff]  ;;  %v464_v32 = vld [vmem:[%s578_s2 + $0x8] sm:$0xff]  ;;  %s583_s30 = smov (!%p170_p4, %s398_s30), 7 }
  0x12   : > { %241 = vmatpush.bf16.msra.mxu0 %v424_v10  ;;  %v454_v24 = vld [vmem:[%s167_s25] sm:$0xff]  ;;  %s453_s4 = sshll.u32 %s583_s30, 4 }
  0x13   : > { %255 = vmatpush.bf16.msra.mxu1 %v428_v11  ;;  %s174_s7 = scalar_lea.vmem %s579_s3, %s453_s4 }
  0x16   : > { %242 = vmatpush.bf16.msra.mxu0 %v416_v16 }
  0x17   : > { %256 = vmatpush.bf16.msra.mxu1 %v420_v17 }
  0x1a   : > { %243 = vmatpush.bf16.msra.mxu0 %v408_v22 }
  0x1b   : > { %257 = vmatpush.bf16.msra.mxu1 %v412_v23 }
  0x1d   : > { %437 = vmatmul.msk.bf16.vlgmr.msra.gmra.mxu0 %vm232_vm0, %v454_v24 }
  0x1e   : > { %438 = vmatmul.msk.bf16.vlgmr.msra.gmra.mxu1 %vm232_vm0, %v454_v24 }
  0x9a   : > { %v245_v25 = vpop.f32.mrf.mxu0 }
  0x9b   : > { %v259_v26 = vpop.f32.mrf.mxu1 }
  0xa2   : > { %v247_v27 = vpop.f32.mrf.mxu0 }
  0xa3   : > { %v261_v28 = vpop.f32.mrf.mxu1  ;;  %v268_v29 = vpack.c.bf16 %v247_v27, %v245_v25 }
  0xa4   : > { %v269_v30 = vpack.c.bf16 %v261_v28, %v259_v26 }
  0xa5   : > { %294 = vmatpush.bf16.msra.mxu2 %v268_v29 }
  0xa6   : > { %313 = vmatpush.bf16.msra.mxu3 %v269_v30 }
  0xa8   : > { %447 = vmatmul.msk.bf16.vlgmr.msra.gmra.mxu2 %vm280_vm1, %v463_v31 }
  0xa9   : > { %449 = vmatmul.msk.bf16.vlgmr.msra.gmra.mxu3 %vm280_vm1, %v463_v31 }
  0xb8   : > { %448 = vmatmul.msk.bf16.gmra.mxu2 %vm280_vm1, %v464_v32 }
  0xb9   : > { %450 = vmatmul.msk.bf16.gmra.mxu3 %vm280_vm1, %v464_v32 }
 0x12b   : > { %v296_v33 = vpop.f32.mrf.mxu2 }
 0x12c   : > { %325 = vst [vmem:[%s174_s7] sm:$0xff] %v296_v33  ;;  %v315_v34 = vpop.f32.mrf.mxu3 }
 0x12d   : > { %326 = vst [vmem:[%s174_s7 + $0x8] sm:$0xff] %v315_v34 }
 0x133   : > { %v298_v35 = vpop.f32.mrf.mxu2 }
 0x134   : > { %327 = vst [vmem:[%s174_s7 + $0x10] sm:$0xff] %v298_v35  ;;  %v317_v36 = vpop.f32.mrf.mxu3 }
 0x135   : > { %328 = vst [vmem:[%s174_s7 + $0x18] sm:$0xff] %v317_v36 }
 0x13b   : > { %v301_v37 = vpop.f32.mrf.mxu2 }
 0x13c   : > { %329 = vst [vmem:[%s174_s7 + $0x20] sm:$0xff] %v301_v37  ;;  %v320_v38 = vpop.f32.mrf.mxu3 }
 0x13d   : > { %330 = vst [vmem:[%s174_s7 + $0x28] sm:$0xff] %v320_v38 }
 0x143   : > { %v303_v39 = vpop.f32.mrf.mxu2 }
 0x144   : > { %331 = vst [vmem:[%s174_s7 + $0x30] sm:$0xff] %v303_v39  ;;  %v322_v40 = vpop.f32.mrf.mxu3 }
 0x145   : > { %332 = vst [vmem:[%s174_s7 + $0x38] sm:$0xff] %v322_v40 }
 0x146 PF: > { %s13_s12 = sadd.s32 1, %s479_s12  }
 0x147   : > { %p10_p5 = scmp.ge.s32.totalorder %s13_s12, 4  }
 0x149   :  { %12 = sbr.rel (!%p10_p5) target bundleno = 1 (0x1), region = 62 }

// kernel: h2aseg_forward.9
= control target key start
LH: loop header
LB: loop body
LE: loop exit
PB: predicated region body
PF: predicated region fallthrough
CT: control target
= control target key end

     0   :  { %s423_s12 = smov 0   ;;  %s463_s0 = inlined_call_operand.vmem [shape: bf16[16,16], index: 0, kind: input, shape index: {}]   ;;  %s464_s1 = inlined_call_operand.vmem [shape: bf16[16,256], index: 1, kind: input, shape index: {}]   ;;  %s465_s2 = inlined_call_operand.vmem [shape: bf16[32,8], index: 2, kind: input, shape index: {}]   ;;  %s466_s3 = inlined_call_operand.vmem [shape: f32[64,256], index: 3, kind: output, shape index: {}]  }
   0x1 LB: > { %s429_s13 = sadd.s32 4294967295, %s401_s12   ;;  %p353_p0 = scmp.ge.s32.totalorder %s401_s12, 1  ;;  %s401_s12 = sphi %s423_s12, %s13_s12  }
   0x2   : > { %p136_p1 = scmp.lt.s32.totalorder %s401_s12, 3 }
   0x4   : > { %p137_p2 = pnand %p353_p0, %p136_p1 }
   0x5   : > { %p160_p3 = scmp.lt.s32.totalorder (!%p137_p2), %s429_s13, 1  ;;  %s355_s4 = sshll.u32 (!%p137_p2), %s429_s13, 2 }
   0x6   : > { %140 = sbr.rel (%p137_p2) target bundleno = 307 (0x133), region = 32  ;;  %p165_p4 = scmp.lt.s32.totalorder (!%p137_p2), %s355_s4, 7 }
   0xb   : > { %v360_v0 = vld [vmem:[%s464_s1] sm:$0xf]  ;;  %v384_v1 = vld [vmem:[%s464_s1 + $0x4] sm:$0xf0]  ;;  %v383_v2 = vld [vmem:[%s464_s1 + $0x4] sm:$0xf] }
   0xc   : > { %v361_v3 = vor.u32 %v384_v1, %v360_v0  ;;  %v362_v4 = vld [vmem:[%s464_s1 + $0x8] sm:$0xf0]  ;;  %s161_s22 = scalar_select %p160_p3, %s429_s13, 1  ;;  %vm185_vm0 = vcmask 130048   ;;  %vm238_vm1 = vcmask 1043456   ;;  %v385_v13 = vld [vmem:[%s465_s2] sm:$0xff] }
   0xd   : > { %v365_v5 = vor.u32 %v383_v2, %v362_v4  ;;  %vm231_vm2 = vcmask 64512   ;;  %v386_v16 = vld [vmem:[%s465_s2 + $0x8] sm:$0xff]  ;;  %s468_s4 = smov (!%p165_p4, %s355_s4), 7 }
   0xe   : > { %196 = vmatpush.bf16.msra.mxu0 %v361_v3  ;;  %s354_s23 = sshll.u32 %s161_s22, 2  ;;  %s382_s5 = sshll.u32 %s468_s4, 4 }
   0xf   : > { %209 = vmatpush.bf16.msra.mxu1 %v365_v5  ;;  %s163_s26 = scalar_lea.vmem %s463_s0, %s354_s23  ;;  %s169_s8 = scalar_lea.vmem %s466_s3, %s382_s5 }
  0x10   : > { %v172_v6 = vld [vmem:[%s163_s26] sm:$0xf] }
  0x11   : > { %366 = vmatmul.msk.bf16.vlgmr.msra.gmra.mxu0 %vm185_vm0, %v172_v6 }
  0x12   : > { %367 = vmatmul.msk.bf16.vlgmr.msra.gmra.mxu1 %vm185_vm0, %v172_v6 }
  0x8e   : > { %v198_v7 = vpop.f32.mrf.mxu0 }
  0x8f   : > { %v211_v8 = vpop.f32.mrf.mxu1  ;;  %v219_v9 = vpack.c.bf16 %v198_v7, %v198_v7 }
  0x90   : > { %v220_v10 = vpack.c.bf16 %v211_v8, %v211_v8 }
  0x91   : > { %v240_v11 = vsel %vm238_vm1, %v219_v9, 0 }
  0x92   : > { %v243_v12 = vsel %vm238_vm1, %v220_v10, 0  ;;  %252 = vmatpush.bf16.msra.mxu2 %v240_v11 }
  0x93   : > { %271 = vmatpush.bf16.msra.mxu3 %v243_v12 }
  0x95   : > { %376 = vmatmul.msk.bf16.vlgmr.msra.gmra.mxu2 %vm231_vm2, %v385_v13 }
  0x96   : > { %378 = vmatmul.msk.bf16.vlgmr.msra.gmra.mxu3 %vm231_vm2, %v385_v13  ;;  %v200_v14 = vpop.f32.mrf.mxu0 }
  0x97   : > { %v213_v15 = vpop.f32.mrf.mxu1 }
  0xa5   : > { %377 = vmatmul.msk.bf16.gmra.mxu2 %vm231_vm2, %v386_v16 }
  0xa6   : > { %379 = vmatmul.msk.bf16.gmra.mxu3 %vm231_vm2, %v386_v16 }
 0x118   : > { %v254_v17 = vpop.f32.mrf.mxu2 }
 0x119   : > { %v273_v18 = vpop.f32.mrf.mxu3  ;;  %283 = vst [vmem:[%s169_s8] sm:$0xff] %v254_v17 }
 0x11a   : > { %284 = vst [vmem:[%s169_s8 + $0x8] sm:$0xff] %v273_v18 }
 0x120   : > { %v256_v19 = vpop.f32.mrf.mxu2 }
 0x121   : > { %v275_v20 = vpop.f32.mrf.mxu3  ;;  %285 = vst [vmem:[%s169_s8 + $0x10] sm:$0xff] %v256_v19 }
 0x122   : > { %286 = vst [vmem:[%s169_s8 + $0x18] sm:$0xff] %v275_v20 }
 0x128   : > { %v259_v21 = vpop.f32.mrf.mxu2 }
 0x129   : > { %v278_v22 = vpop.f32.mrf.mxu3  ;;  %287 = vst [vmem:[%s169_s8 + $0x20] sm:$0xff] %v259_v21 }
 0x12a   : > { %288 = vst [vmem:[%s169_s8 + $0x28] sm:$0xff] %v278_v22 }
 0x130   : > { %v261_v23 = vpop.f32.mrf.mxu2 }
 0x131   : > { %v280_v24 = vpop.f32.mrf.mxu3  ;;  %289 = vst [vmem:[%s169_s8 + $0x30] sm:$0xff] %v261_v23 }
 0x132   : > { %290 = vst [vmem:[%s169_s8 + $0x38] sm:$0xff] %v280_v24 }
 0x133 PF: > { %s13_s12 = sadd.s32 1, %s401_s12  }
 0x134   : > { %p10_p5 = scmp.ge.s32.totalorder %s13_s12, 4  }
 0x136   :  { %12 = sbr.rel (!%p10_p5) target bundleno = 1 (0x1), region = 62 }

// kernel: h2aseg_forward.10
= control target key start
LH: loop header
LB: loop body
LE: loop exit
PB: predicated region body
PF: predicated region fallthrough
CT: control target
= control target key end

     0   :  { %vm25_vm0 = vcmask 1041408   ;;  %vm21_vm1 = vcmask 31744   ;;  %vm99_vm2 = vcmask 1043456   ;;  %vm86_vm3 = vcmask 64512   ;;  %s302_s1 = inlined_call_operand.vmem [shape: bf16[4,256], index: 1, kind: input, shape index: {}]   ;;  %s303_s0 = inlined_call_operand.vmem [shape: bf16[8,4], index: 0, kind: input, shape index: {}]   ;;  %s304_s2 = inlined_call_operand.vmem [shape: bf16[64,8], index: 2, kind: input, shape index: {}]   ;;  %s305_s3 = inlined_call_operand.vmem [shape: f32[64,256], index: 3, kind: output, shape index: {}]  }
   0x1   :  { %v16_v0 = vld [vmem:[%s302_s1] sm:$0xf]  ;;  %v211_v12 = vld [vmem:[%s304_s2 + $0x8] sm:$0xff]  ;;  %v212_v16 = vld [vmem:[%s304_s2 + $0x10] sm:$0xff] }
   0x2   :  { %18 = vst [vmem:[#allocation1] ss:$4 sm:$0xff] %v16_v0  ;;  %v15_v5 = vld [vmem:[%s303_s0] sm:$0xf]  ;;  %v213_v17 = vld [vmem:[%s304_s2 + $0x18] sm:$0xff] }
   0x3   :  { %v210_v13 = vld [vmem:[%s304_s2] sm:$0xff] }
   0x9   :  { %v19_v1 = vld.sshfl [vmem:[#allocation1] sm:$0xff pattern:$0x73625140]  ;;  %v20_v2 = vld.sshfl [vmem:[#allocation1 + $0x8] sm:$0xff pattern:$0x73625140] }
   0xa   :  { %v26_v3 = vsel %vm25_vm0, %v19_v1, 0  ;;  %v28_v4 = vsel %vm25_vm0, %v20_v2, 0 }
   0xb   :  { %37 = vmatpush.bf16.msra.mxu0 %v26_v3  ;;  %50 = vmatpush.bf16.msra.mxu1 %v28_v4 }
   0xe   :  { %184 = vmatmul.msk.bf16.vlgmr.msra.gmra.mxu0 %vm21_vm1, %v15_v5  ;;  %185 = vmatmul.msk.bf16.vlgmr.msra.gmra.mxu1 %vm21_vm1, %v15_v5 }
  0x8b   :  { %v39_v6 = vpop.f32.mrf.mxu0  ;;  %v52_v7 = vpop.f32.mrf.mxu1 }
  0x8c   :  { %v64_v8 = vpack.c.bf16 %v39_v6, %v39_v6  ;;  %v65_v9 = vpack.c.bf16 %v52_v7, %v52_v7 }
  0x8e   :  { %v101_v10 = vsel %vm99_vm2, %v64_v8, 0  ;;  %v104_v11 = vsel %vm99_vm2, %v65_v9, 0 }
  0x8f   :  { %113 = vmatpush.bf16.msrb.mxu0 %v101_v10  ;;  %214 = vmatpush.bf16.msra.mxu2 %v101_v10 }
  0x90   :  { %142 = vmatpush.bf16.msrb.mxu1 %v104_v11  ;;  %215 = vmatpush.bf16.msra.mxu3 %v104_v11 }
  0x92   :  { %203 = vmatmul.msk.bf16.vlgmr.msra.gmra.mxu2 %vm86_vm3, %v211_v12  ;;  %202 = vmatmul.msk.bf16.vlgmr.msrb.gmra.mxu0 %vm86_vm3, %v210_v13 }
  0x93   :  { %207 = vmatmul.msk.bf16.vlgmr.msra.gmra.mxu3 %vm86_vm3, %v211_v12  ;;  %v41_v14 = vpop.f32.mrf.mxu0  ;;  %v54_v15 = vpop.f32.mrf.mxu1  ;;  %206 = vmatmul.msk.bf16.vlgmr.msrb.gmra.mxu1 %vm86_vm3, %v210_v13 }
  0xa2   :  { %204 = vmatmul.msk.bf16.gmra.mxu2 %vm86_vm3, %v212_v16 }
  0xa3   :  { %208 = vmatmul.msk.bf16.gmra.mxu3 %vm86_vm3, %v212_v16 }
  0xb2   :  { %205 = vmatmul.msk.bf16.gmra.mxu2 %vm86_vm3, %v213_v17 }
  0xb3   :  { %209 = vmatmul.msk.bf16.gmra.mxu3 %vm86_vm3, %v213_v17 }
 0x10f   :  { %v115_v18 = vpop.f32.mrf.mxu0 }
 0x110   :  { %164 = vst [vmem:[%s305_s3] sm:$0xff] %v115_v18  ;;  %v144_v19 = vpop.f32.mrf.mxu1 }
 0x111   :  { %165 = vst [vmem:[%s305_s3 + $0x8] sm:$0xff] %v144_v19 }
 0x115   :  { %v120_v20 = vpop.f32.mrf.mxu2 }
 0x116   :  { %168 = vst [vmem:[%s305_s3 + $0x20] sm:$0xff] %v120_v20  ;;  %v149_v21 = vpop.f32.mrf.mxu3 }
 0x117   :  { %169 = vst [vmem:[%s305_s3 + $0x28] sm:$0xff] %v149_v21  ;;  %v117_v22 = vpop.f32.mrf.mxu0 }
 0x118   :  { %166 = vst [vmem:[%s305_s3 + $0x10] sm:$0xff] %v117_v22  ;;  %v146_v23 = vpop.f32.mrf.mxu1 }
 0x119   :  { %167 = vst [vmem:[%s305_s3 + $0x18] sm:$0xff] %v146_v23 }
 0x11d   :  { %v122_v24 = vpop.f32.mrf.mxu2 }
 0x11e   :  { %170 = vst [vmem:[%s305_s3 + $0x30] sm:$0xff] %v122_v24  ;;  %v151_v25 = vpop.f32.mrf.mxu3 }
 0x11f   :  { %171 = vst [vmem:[%s305_s3 + $0x38] sm:$0xff] %v151_v25 }
 0x125   :  { %v125_v26 = vpop.f32.mrf.mxu2 }
 0x126   :  { %172 = vst [vmem:[%s305_s3 + $0x40] sm:$0xff] %v125_v26  ;;  %v154_v27 = vpop.f32.mrf.mxu3 }
 0x127   :  { %173 = vst [vmem:[%s305_s3 + $0x48] sm:$0xff] %v154_v27 }
 0x12d   :  { %v127_v28 = vpop.f32.mrf.mxu2 }
 0x12e   :  { %174 = vst [vmem:[%s305_s3 + $0x50] sm:$0xff] %v127_v28  ;;  %v156_v29 = vpop.f32.mrf.mxu3 }
 0x12f   :  { %175 = vst [vmem:[%s305_s3 + $0x58] sm:$0xff] %v156_v29 }
 0x135   :  { %v130_v30 = vpop.f32.mrf.mxu2 }
 0x136   :  { %176 = vst [vmem:[%s305_s3 + $0x60] sm:$0xff] %v130_v30  ;;  %v159_v31 = vpop.f32.mrf.mxu3 }
 0x137   :  { %177 = vst [vmem:[%s305_s3 + $0x68] sm:$0xff] %v159_v31 }
 0x13d   :  { %v132_v32 = vpop.f32.mrf.mxu2 }
 0x13e   :  { %178 = vst [vmem:[%s305_s3 + $0x70] sm:$0xff] %v132_v32  ;;  %v161_v33 = vpop.f32.mrf.mxu3 }
 0x13f   :  { %179 = vst [vmem:[%s305_s3 + $0x78] sm:$0xff] %v161_v33 }

// kernel: h2aseg_forward.11
= control target key start
LH: loop header
LB: loop body
LE: loop exit
PB: predicated region body
PF: predicated region fallthrough
CT: control target
= control target key end

     0   :  { %vm25_vm0 = vcmask 1040384   ;;  %v219_v1 = vmov 0   ;;  %vm21_vm1 = vcmask 7168   ;;  %vm101_vm2 = vcmask 1041408   ;;  %s306_s1 = inlined_call_operand.vmem [shape: bf16[1,256], index: 1, kind: input, shape index: {}]   ;;  %s307_s0 = inlined_call_operand.vmem [shape: bf16[4,1], index: 0, kind: input, shape index: {}]   ;;  %s308_s2 = inlined_call_operand.vmem [shape: bf16[64,4], index: 2, kind: input, shape index: {}]   ;;  %s309_s3 = inlined_call_operand.vmem [shape: f32[64,256], index: 3, kind: output, shape index: {}]  }
   0x1   :  { %v16_v0 = vld [vmem:[%s306_s1] sm:$0x3]  ;;  %v27_v2 = vsel %vm25_vm0, 65535, %v219_v1  ;;  %v213_v14 = vld [vmem:[%s308_s2 + $0x8] sm:$0xff]  ;;  %vm88_vm3 = vcmask 31744   ;;  %v214_v18 = vld [vmem:[%s308_s2 + $0x10] sm:$0xff] }
   0x2   :  { %18 = vst [vmem:[#allocation1] ss:$9 sm:$0xff] %v16_v0  ;;  %v15_v7 = vld [vmem:[%s307_s0] sm:$0x3]  ;;  %v215_v19 = vld [vmem:[%s308_s2 + $0x18] sm:$0xff] }
   0x3   :  { %v212_v15 = vld [vmem:[%s308_s2] sm:$0xff] }
   0x9   :  { %v19_v3 = vld [vmem:[#allocation1] sm:$0xff]  ;;  %v20_v4 = vld [vmem:[#allocation1 + $0x9] sm:$0xff] }
   0xa   :  { %v28_v5 = vand.u32 %v27_v2, %v19_v3  ;;  %v30_v6 = vand.u32 %v27_v2, %v20_v4 }
   0xc   :  { %39 = vmatpush.bf16.msra.mxu0 %v28_v5  ;;  %52 = vmatpush.bf16.msra.mxu1 %v30_v6 }
   0xf   :  { %186 = vmatmul.msk.bf16.vlgmr.msra.gmra.mxu0 %vm21_vm1, %v15_v7  ;;  %187 = vmatmul.msk.bf16.vlgmr.msra.gmra.mxu1 %vm21_vm1, %v15_v7 }
  0x8c   :  { %v41_v8 = vpop.f32.mrf.mxu0  ;;  %v54_v9 = vpop.f32.mrf.mxu1 }
  0x8d   :  { %v66_v10 = vpack.c.bf16 %v41_v8, %v41_v8  ;;  %v67_v11 = vpack.c.bf16 %v54_v9, %v54_v9 }
  0x8f   :  { %v103_v12 = vsel %vm101_vm2, %v66_v10, 0  ;;  %v106_v13 = vsel %vm101_vm2, %v67_v11, 0 }
  0x90   :  { %115 = vmatpush.bf16.msrb.mxu0 %v103_v12  ;;  %216 = vmatpush.bf16.msra.mxu2 %v103_v12 }
  0x91   :  { %144 = vmatpush.bf16.msrb.mxu1 %v106_v13  ;;  %217 = vmatpush.bf16.msra.mxu3 %v106_v13 }
  0x93   :  { %205 = vmatmul.msk.bf16.vlgmr.msra.gmra.mxu2 %vm88_vm3, %v213_v14  ;;  %204 = vmatmul.msk.bf16.vlgmr.msrb.gmra.mxu0 %vm88_vm3, %v212_v15 }
  0x94   :  { %209 = vmatmul.msk.bf16.vlgmr.msra.gmra.mxu3 %vm88_vm3, %v213_v14  ;;  %v43_v16 = vpop.f32.mrf.mxu0  ;;  %v56_v17 = vpop.f32.mrf.mxu1  ;;  %208 = vmatmul.msk.bf16.vlgmr.msrb.gmra.mxu1 %vm88_vm3, %v212_v15 }
  0xa3   :  { %206 = vmatmul.msk.bf16.gmra.mxu2 %vm88_vm3, %v214_v18 }
  0xa4   :  { %210 = vmatmul.msk.bf16.gmra.mxu3 %vm88_vm3, %v214_v18 }
  0xb3   :  { %207 = vmatmul.msk.bf16.gmra.mxu2 %vm88_vm3, %v215_v19 }
  0xb4   :  { %211 = vmatmul.msk.bf16.gmra.mxu3 %vm88_vm3, %v215_v19 }
 0x110   :  { %v117_v20 = vpop.f32.mrf.mxu0 }
 0x111   :  { %166 = vst [vmem:[%s309_s3] sm:$0xff] %v117_v20  ;;  %v146_v21 = vpop.f32.mrf.mxu1 }
 0x112   :  { %167 = vst [vmem:[%s309_s3 + $0x8] sm:$0xff] %v146_v21 }
 0x116   :  { %v122_v22 = vpop.f32.mrf.mxu2 }
 0x117   :  { %170 = vst [vmem:[%s309_s3 + $0x20] sm:$0xff] %v122_v22  ;;  %v151_v23 = vpop.f32.mrf.mxu3 }
 0x118   :  { %171 = vst [vmem:[%s309_s3 + $0x28] sm:$0xff] %v151_v23  ;;  %v119_v24 = vpop.f32.mrf.mxu0 }
 0x119   :  { %168 = vst [vmem:[%s309_s3 + $0x10] sm:$0xff] %v119_v24  ;;  %v148_v25 = vpop.f32.mrf.mxu1 }
 0x11a   :  { %169 = vst [vmem:[%s309_s3 + $0x18] sm:$0xff] %v148_v25 }
 0x11e   :  { %v124_v26 = vpop.f32.mrf.mxu2 }
 0x11f   :  { %172 = vst [vmem:[%s309_s3 + $0x30] sm:$0xff] %v124_v26  ;;  %v153_v27 = vpop.f32.mrf.mxu3 }
 0x120   :  { %173 = vst [vmem:[%s309_s3 + $0x38] sm:$0xff] %v153_v27 }
 0x126   :  { %v127_v28 = vpop.f32.mrf.mxu2 }
 0x127   :  { %174 = vst [vmem:[%s309_s3 + $0x40] sm:$0xff] %v127_v28  ;;  %v156_v29 = vpop.f32.mrf.mxu3 }
 0x128   :  { %175 = vst [vmem:[%s309_s3 + $0x48] sm:$0xff] %v156_v29 }
 0x12e   :  { %v129_v30 = vpop.f32.mrf.mxu2 }
 0x12f   :  { %176 = vst [vmem:[%s309_s3 + $0x50] sm:$0xff] %v129_v30  ;;  %v158_v31 = vpop.f32.mrf.mxu3 }
 0x130   :  { %177 = vst [vmem:[%s309_s3 + $0x58] sm:$0xff] %v158_v31 }
 0x136   :  { %v132_v32 = vpop.f32.mrf.mxu2 }
 0x137   :  { %178 = vst [vmem:[%s309_s3 + $0x60] sm:$0xff] %v132_v32  ;;  %v161_v33 = vpop.f32.mrf.mxu3 }
 0x138   :  { %179 = vst [vmem:[%s309_s3 + $0x68] sm:$0xff] %v161_v33 }
 0x13e   :  { %v134_v34 = vpop.f32.mrf.mxu2 }
 0x13f   :  { %180 = vst [vmem:[%s309_s3 + $0x70] sm:$0xff] %v134_v34  ;;  %v163_v35 = vpop.f32.mrf.mxu3 }
 0x140   :  { %181 = vst [vmem:[%s309_s3 + $0x78] sm:$0xff] %v163_v35 }

// kernel: h2aseg_forward.6
= control target key start
LH: loop header
LB: loop body
LE: loop exit
PB: predicated region body
PF: predicated region fallthrough
CT: control target
= control target key end

     0   :  { %9 = vsyncpa [#allocation3], 0  ;;  %s737_s0 = inlined_call_operand.vmem [shape: f32[2,2], index: 0, kind: input, shape index: {}]   ;;  %s738_s1 = inlined_call_operand.vmem [shape: f32[2], index: 1, kind: input, shape index: {}]   ;;  %s739_s2 = inlined_call_operand.vmem [shape: f32[2,1,2,2048], index: 2, kind: input, shape index: {}]   ;;  %s740_s3 = inlined_call_operand.vmem [shape: f32[2,1,2,2048], index: 3, kind: input, shape index: {}]   ;;  %s741_s4 = inlined_call_operand.vmem [shape: f32[2,2,2,2048], index: 4, kind: output, shape index: {}]  }
   0x1   :  { %10 = vsyncpa [#allocation5], 0  ;;  %s662_s15 = smov 0   ;;  %s664_s16 = smov 0  }
   0x2   :  { %s666_s17 = smov 0  }
   0x3 LB: > { %s500_s18 = sadd.s32 4294967295, %s633_s17   ;;  %s28_s19 = sadd.s32 1, %s629_s16  ;;  %s633_s17 = sphi %s666_s17, %s16_s17   ;;  %s629_s16 = sphi %s664_s16, %s744_s16   ;;  %s625_s15 = sphi %s662_s15, %s743_s15  }
   0x4   : > { %p30_p0 = scmp.ge.s32.totalorder %s28_s19, 2  ;;  %p502_p1 = scmp.ge.s32.totalorder %s633_s17, 1 }
   0x5   : > { %p159_p2 = scmp.lt.s32.totalorder %s633_s17, 3  ;;  %p683_p4 = scmp.eq.s32.totalorder %s500_s18, 0 }
   0x6   : > { %s746_s19 = smov (%p30_p0, %s28_s19), 0  ;;  %s171_s23 = sshll.u32 %s737_s0, 4  ;;  %s172_s23 = int_to_ptr.vmem [resolvable:$true] %s171_s23 }
   0x7   : > { %p160_p3 = pnand %p502_p1, %p159_p2  ;;  %s181_s26 = sshll.u32 %s738_s1, 4  ;;  %s182_s26 = int_to_ptr.vmem [resolvable:$true] %s181_s26 }
   0x8   : > { %s635_s27 = smov [#allocation2]   ;;  %s636_s28 = smov [#allocation4]  }
   0x9   : > { %p536_p5 = pneg %p160_p3 }
   0xa   : > { %218 = sbr.rel (%p160_p3) target bundleno = 43 (0x2b), region = 36 }
   0xb   : > { %p537_p6 = pnand %p683_p4, %p536_p5 }
   0xd   : > { %539 = dma.vmem_to_smem (!%p537_p6), %s172_s23, 32, %s635_s27, [#allocation3]  }
   0xe   : > { %542 = dma.vmem_to_smem (!%p537_p6), %s182_s26, 16, %s636_s28, [#allocation5]  }
   0xf   : > { %616 = dma.done.wait (%p683_p4), [#allocation3], 32  }
  0x10   : > { %618 = vsyncadd (%p683_p4), [#allocation3], 4294967264 }
  0x11   : > { %620 = dma.done.wait (%p683_p4), [#allocation5], 16  }
  0x12   : > { %622 = vsyncadd (%p683_p4), [#allocation5], 4294967280 }
  0x13   : > { %230 = sfence }
  0x14   : > { %p268_p7 = scmp.lt.s32.totalorder %s625_s15, 1  ;;  %s295_s29 = sld [smem:[#allocation4]] }
  0x15   : > { %s297_s30 = sld [smem:[#allocation2]] }
  0x16   : > { %s748_s15 = smov (!%p268_p7, %s625_s15), 1  ;;  %s515_s5 = sld [smem:[#allocation2 + $0x80]] }
  0x17   : > { %s525_s6 = sshll.u32 %s748_s15, 5  ;;  %s516_s13 = sld [smem:[#allocation4 + $0x1]] }
  0x18   : > { %s276_s9 = scalar_lea.vmem %s739_s2, %s525_s6  ;;  %s285_s12 = scalar_lea.vmem %s740_s3, %s525_s6 }
  0x19   : > { %v298_v1 = vld [vmem:[%s276_s9] sm:$0xff]  ;;  %v299_v2 = vld [vmem:[%s276_s9 + $0x8] sm:$0xff]  ;;  %v300_v6 = vld [vmem:[%s276_s9 + $0x10] sm:$0xff]  ;;  %s517_s14 = sld [smem:[#allocation2 + $0x1]]  ;;  %s527_s18 = sshll.u32 %s748_s15, 6 }
  0x1a   : > { %v296_v0 = vstv %s295_s29  ;;  %v312_v4 = vld [vmem:[%s285_s12] sm:$0xff]  ;;  %v313_v5 = vld [vmem:[%s285_s12 + $0x8] sm:$0xff]  ;;  %v314_v10 = vld [vmem:[%s285_s12 + $0x10] sm:$0xff]  ;;  %s518_s20 = sld [smem:[#allocation2 + $0x81]]  ;;  %s718_s23 = scalar_lea.vmem %s741_s4, %s527_s18 }
  0x1b   : > { %v302_v3 = vstv %s297_s30  ;;  %v301_v11 = vld [vmem:[%s276_s9 + $0x18] sm:$0xff] }
  0x1c   : > { %v303_v7 = vmul.f32 %v302_v3, %v298_v1  ;;  %v304_v8 = vmul.f32 %v302_v3, %v299_v2  ;;  %v305_v9 = vmul.f32 %v302_v3, %v300_v6  ;;  %v315_v12 = vld [vmem:[%s285_s12 + $0x18] sm:$0xff]  ;;  %v316_v13 = vstv %s515_s5 }
  0x1d   : > { %v306_v14 = vmul.f32 %v302_v3, %v301_v11  ;;  %v317_v16 = vmul.f32 %v316_v13, %v312_v4  ;;  %v318_v18 = vmul.f32 %v316_v13, %v313_v5  ;;  %v319_v20 = vmul.f32 %v316_v13, %v314_v10 }
  0x1e   : > { %v307_v15 = vadd.f32 %v303_v7, %v296_v0  ;;  %v308_v17 = vadd.f32 %v304_v8, %v296_v0  ;;  %v309_v19 = vadd.f32 %v305_v9, %v296_v0  ;;  %v320_v22 = vmul.f32 %v316_v13, %v315_v12 }
  0x1f   : > { %v310_v21 = vadd.f32 %v306_v14, %v296_v0  ;;  %v330_v27 = vstv %s516_s13  ;;  %v336_v28 = vstv %s517_s14 }
  0x20   : > { %v321_v23 = vadd.f32 %v317_v16, %v307_v15  ;;  %v322_v24 = vadd.f32 %v318_v18, %v308_v17  ;;  %v323_v25 = vadd.f32 %v319_v20, %v309_v19  ;;  %v337_v29 = vmul.f32 %v336_v28, %v298_v1 }
  0x21   : > { %v324_v26 = vadd.f32 %v320_v22, %v310_v21  ;;  %v350_v30 = vstv %s518_s20  ;;  %v338_v31 = vmul.f32 %v336_v28, %v299_v2  ;;  %v339_v32 = vmul.f32 %v336_v28, %v300_v6 }
  0x22   : > { %325 = vst [vmem:[%s718_s23] sm:$0xff] %v321_v23  ;;  %v351_v33 = vmul.f32 %v350_v30, %v312_v4  ;;  %v352_v34 = vmul.f32 %v350_v30, %v313_v5  ;;  %v353_v35 = vmul.f32 %v350_v30, %v314_v10  ;;  %v340_v36 = vmul.f32 %v336_v28, %v301_v11 }
  0x23   : > { %326 = vst [vmem:[%s718_s23 + $0x8] sm:$0xff] %v322_v24  ;;  %v341_v37 = vadd.f32 %v337_v29, %v330_v27  ;;  %v342_v38 = vadd.f32 %v338_v31, %v330_v27  ;;  %v343_v39 = vadd.f32 %v339_v32, %v330_v27  ;;  %v354_v40 = vmul.f32 %v350_v30, %v315_v12 }
  0x24   : > { %327 = vst [vmem:[%s718_s23 + $0x10] sm:$0xff] %v323_v25  ;;  %v344_v41 = vadd.f32 %v340_v36, %v330_v27 }
  0x25   : > { %328 = vst [vmem:[%s718_s23 + $0x18] sm:$0xff] %v324_v26  ;;  %v355_v42 = vadd.f32 %v351_v33, %v341_v37  ;;  %v356_v43 = vadd.f32 %v352_v34, %v342_v38  ;;  %v357_v44 = vadd.f32 %v353_v35, %v343_v39 }
  0x26   : > { %v358_v45 = vadd.f32 %v354_v40, %v344_v41 }
  0x27   : > { %519 = vst [vmem:[%s718_s23 + $0x20] sm:$0xff] %v355_v42 }
  0x28   : > { %520 = vst [vmem:[%s718_s23 + $0x28] sm:$0xff] %v356_v43 }
  0x29   : > { %521 = vst [vmem:[%s718_s23 + $0x30] sm:$0xff] %v357_v44 }
  0x2a   : > { %522 = vst [vmem:[%s718_s23 + $0x38] sm:$0xff] %v358_v45 }
  0x2b PF: > { %s16_s17 = sadd.s32 1, %s633_s17   ;;  %s743_s15 = smov %s629_s16 }
  0x2c   : > { %p13_p8 = scmp.ge.s32.totalorder %s16_s17, 4   ;;  %s744_s16 = smov %s746_s19 }
  0x2e   :  { %15 = sbr.rel (!%p13_p8) target bundleno = 3 (0x3), region = 79 }
  0x33   :  { %393 = vsyncpa [#allocation3], 1 }
  0x34   :  { %395 = vsyncpa [#allocation3 + $0x1], 1 }
  0x35   :  { %396 = vsyncpa [#allocation5], 1 }

</bundles_post_ra>
